<compile_context>
chip_gen: v5e
topology: v5e:2x2
jax: 0.10.0
libtpu: 0.0.40
codegen_flags: <defaults>
</compile_context>

<pallas_src>
import functools

import jax
import jax.numpy as jnp
from jax.experimental import pallas as pl
from jax.experimental.pallas import tpu as pltpu


TILE_CAP = 32768            # lanes per tile (multiple of 128); ~6 MB VMEM w/ dbl-buffer
_CASE1_XLA_THRESHOLD = 16384  # below this, case1 is a single fused XLA op


# ---------------- kernels ----------------

def _rs_kernel(xt_ref, theta_ref, o_ref, *, epsilon):
    # xt_ref: (F, TILE_N) VMEM; theta_ref: (F, 1) VMEM (grid-invariant, DMA'd
    # once); o_ref: (1, TILE_N) VMEM (lane-dense, unmasked stores).
    # y = sum_F(X^T * theta): VPU broadcast-mul + cross-sublane reduce — an
    # F=11 / width-1 matvec would leave the MXU idle, and once tiles are large
    # the kernel is HBM-bound so the VPU/XLU/EUP slots are nowhere near
    # binding.  Exact sigmoid kept (approx reciprocal risks the 1e-5 tol).
    y = jnp.sum(xt_ref[...] * theta_ref[...], axis=0, keepdims=True)
    o_ref[...] = jax.nn.sigmoid(y) * (1.0 - epsilon)


def _case1_kernel(x_ref, scale_ref, o_ref):
    # x_ref/o_ref: (8, TILE_C) VMEM lane-dense slab; scale_ref: (1,) SMEM.
    # y = X[:, 0] * (tanh(theta) + 2) / epsilon  (scale precomputed in wrapper)
    o_ref[...] = x_ref[...] * scale_ref[0]


# ---------------- tiling helpers ----------------

def _cdiv(a, b):
    return (a + b - 1) // b


def _round_up(n, m):
    return _cdiv(n, m) * m


def _batch_tiling(n, tile_cap):
    """Balanced, 128-multiple lane tiling of a length-n axis, capped at tile_cap.

    n <= cap  -> single tile (no extra sequential grid steps on 1-TC chips).
    n  > cap  -> >= 2 balanced tiles (both v7x TensorCores get work, less pad).
    """
    n_eff = max(int(n), 1)
    if n_eff <= tile_cap:
        tile = _round_up(n_eff, 128)
    else:
        num_tiles = _cdiv(n_eff, tile_cap)
        tile = _round_up(_cdiv(n_eff, num_tiles), 128)
    return tile, _round_up(n_eff, tile)


# ---------------- wrapper ----------------

def onelayer_nn_forward(X, theta, epsilon, mode, *, tile_cap=TILE_CAP,
                        force_pallas=False):
    """Forward pass of onelayer_NN. Returns a (batch,) float32 vector."""
    X = jnp.asarray(X, jnp.float32)
    theta = jnp.asarray(theta, jnp.float32)
    N, F = X.shape

    if mode == "RS":
        tile_n, n_pad = _batch_tiling(N, tile_cap)
        grid = (n_pad // tile_n,)
        # Transposed, lane-dense layout: (F, n_pad), batch on the 128-lane
        # axis.  Built as a single fusable pad(transpose) — and the operand is
        # marked for input fusion — instead of a materialized zero-padded copy
        # (which cost an extra full HBM pass).
        xt = jnp.pad(X.T, ((0, 0), (0, n_pad - N)))
        kern = functools.partial(_rs_kernel, epsilon=float(epsilon))
        out = pl.pallas_call(
            kern,
            grid=grid,
            in_specs=[
                pl.BlockSpec((F, tile_n), lambda i: (0, i)),
                pl.BlockSpec((F, 1), lambda i: (0, 0)),  # grid-invariant theta
            ],
            out_specs=pl.BlockSpec((1, tile_n), lambda i: (0, i)),
            out_shape=jax.ShapeDtypeStruct((1, n_pad), jnp.float32),
            compiler_params=pltpu.CompilerParams(
                dimension_semantics=("parallel",),
                allow_input_fusion=[True, False],
            ),
        )(xt, theta.reshape(F, 1))
        return out[0, :N]

    elif mode == "case1":
        scale = (jnp.tanh(theta[0]) + 2.0) / jnp.float32(epsilon)
        if not force_pallas and N <= _CASE1_XLA_THRESHOLD:
            # One fused gather-multiply; a pallas launch + pad pass is pure
            # overhead at this size (perf review).
            return X[:, 0] * scale

        # Pallas path (huge N): (8, cols) lane-dense slab so vld/vst use all 8
        # sublanes; only column 0 of X is touched; scalar math hoisted to SMEM.
        cols_needed = _cdiv(N, 8)
        tile_c, cols_pad = _batch_tiling(cols_needed, tile_cap)
        total = 8 * cols_pad
        x0_slab = jnp.pad(X[:, 0], (0, total - N)).reshape(8, cols_pad)
        out = pl.pallas_call(
            _case1_kernel,
            grid=(cols_pad // tile_c,),
            in_specs=[
                pl.BlockSpec((8, tile_c), lambda i: (0, i)),
                pl.BlockSpec(memory_space=pltpu.MemorySpace.SMEM),
            ],
            out_specs=pl.BlockSpec((8, tile_c), lambda i: (0, i)),
            out_shape=jax.ShapeDtypeStruct((8, cols_pad), jnp.float32),
            compiler_params=pltpu.CompilerParams(
                dimension_semantics=("parallel",)),
        )(x0_slab, scale.reshape(1))
        return out.reshape(-1)[:N]

    else:
        raise ValueError(f"unknown mode: {mode}")


# ---------------- reference (pure JAX) ----------------

def _ref_forward(X, theta, epsilon, mode):
    X = jnp.asarray(X, jnp.float32)
    theta = jnp.asarray(theta, jnp.float32)
    if mode == "RS":
        y = X @ theta
        return jax.nn.sigmoid(y) * (1.0 - epsilon)
    else:  # case1
        return X[:, 0] * (jnp.tanh(theta[0]) + 2.0) / epsilon


# ---------------- main ----------------

if __name__ == "__main__":
    key = jax.random.PRNGKey(0)
    k1, k2, k3, k4 = jax.random.split(key, 4)
    epsilon = 0.1

    # ---- RS mode: theta ~ N(0,1) of shape (11,), X is (batch, 11) ----
    X_rs = jax.random.normal(k1, (8, 11), dtype=jnp.float32)
    theta_rs = jax.random.normal(k2, (11,), dtype=jnp.float32)
    y_rs = onelayer_nn_forward(X_rs, theta_rs, epsilon, "RS")
    jax.block_until_ready(y_rs)
    assert y_rs.shape == (8,)
    assert jnp.allclose(y_rs, _ref_forward(X_rs, theta_rs, epsilon, "RS"),
                        atol=1e-5, rtol=1e-5)

    # ---- RS mode, larger batch with a small tile cap so the multi-tile grid,
    # balanced tiling and padding paths are exercised at small shapes ----
    X_rs2 = jax.random.normal(k4, (700, 11), dtype=jnp.float32)
    y_rs2 = onelayer_nn_forward(X_rs2, theta_rs, epsilon, "RS", tile_cap=256)
    jax.block_until_ready(y_rs2)
    assert y_rs2.shape == (700,)
    assert jnp.allclose(y_rs2, _ref_forward(X_rs2, theta_rs, epsilon, "RS"),
                        atol=1e-5, rtol=1e-5)

    # ---- case1 mode: theta = atanh(0.5), only X[:, 0] is used ----
    X_c1 = jax.random.normal(k3, (8, 4), dtype=jnp.float32)
    theta_c1 = jnp.array([jnp.arctanh(jnp.float32(0.5))], dtype=jnp.float32)

    # default: small-N fused XLA path (per perf review)
    y_c1 = onelayer_nn_forward(X_c1, theta_c1, epsilon, "case1")
    jax.block_until_ready(y_c1)
    y_c1_ref = _ref_forward(X_c1, theta_c1, epsilon, "case1")
    assert y_c1.shape == (8,)
    assert jnp.allclose(y_c1, y_c1_ref, atol=1e-5, rtol=1e-5)

    # forced Pallas path: (8, tile) slab kernel
    y_c1p = onelayer_nn_forward(X_c1, theta_c1, epsilon, "case1",
                                force_pallas=True)
    jax.block_until_ready(y_c1p)
    assert y_c1p.shape == (8,)
    assert jnp.allclose(y_c1p, y_c1_ref, atol=1e-5, rtol=1e-5)

    print("KERNEL_OK")
</pallas_src>

<mosaic_0001>
module attributes {stable_mosaic.version = 11 : i64} {
  func.func @_rs_kernel(%arg0: i32, %arg1: memref<11x128xf32, #tpu.memory_space<vmem>>, %arg2: memref<11x1xf32, #tpu.memory_space<vmem>>, %arg3: memref<1x128xf32, #tpu.memory_space<vmem>>) attributes {dimension_semantics = [#tpu.dimension_semantics<parallel>], iteration_bounds = array<i64: 1>, scalar_prefetch = 0 : i64, scratch_operands = 0 : i64, tpu.core_type = #tpu.core_type<tc>, window_params = [{transform_indices = @transform_0, window_bounds = array<i64: 11, 128>}, {pipeline_mode = #tpu.pipeline_mode<synchronous>, transform_indices = @transform_1, window_bounds = array<i64: 11, 1>}, {transform_indices = @transform_2, window_bounds = array<i64: 1, 128>}]} {
    %c0 = arith.constant 0 : index
    %c0_0 = arith.constant 0 : index
    %0 = vector.load %arg1[%c0, %c0_0] : memref<11x128xf32, #tpu.memory_space<vmem>>, vector<11x128xf32>
    %c0_1 = arith.constant 0 : index
    %c0_2 = arith.constant 0 : index
    %1 = vector.load %arg2[%c0_1, %c0_2] : memref<11x1xf32, #tpu.memory_space<vmem>>, vector<11x1xf32>
    %2 = vector.broadcast %1 : vector<11x1xf32> to vector<11x128xf32>
    %3 = arith.mulf %0, %2 : vector<11x128xf32>
    %cst = arith.constant dense<0.000000e+00> : vector<128xf32>
    %4 = vector.multi_reduction <add>, %3, %cst [0] : vector<11x128xf32> to vector<128xf32>
    %5 = vector.shape_cast %4 : vector<128xf32> to vector<1x128xf32>
    %6 = arith.negf %5 : vector<1x128xf32>
    %7 = math.exp %6 : vector<1x128xf32>
    %cst_3 = arith.constant 1.000000e+00 : f32
    %8 = vector.broadcast %cst_3 : f32 to vector<1x128xf32>
    %9 = arith.addf %8, %7 : vector<1x128xf32>
    %10 = arith.divf %8, %9 : vector<1x128xf32>
    %cst_4 = arith.constant 0.899999976 : f32
    %11 = vector.broadcast %cst_4 : f32 to vector<1x128xf32>
    %12 = arith.mulf %10, %11 : vector<1x128xf32>
    %c0_5 = arith.constant 0 : index
    %c0_6 = arith.constant 0 : index
    %13 = vector.load %arg3[%c0_5, %c0_6] : memref<1x128xf32, #tpu.memory_space<vmem>>, vector<1x128xf32>
    tpu.vector_store %arg3[%c0_5, %c0_6], %12 {strides = array<i32>} : memref<1x128xf32, #tpu.memory_space<vmem>>, vector<1x128xf32>,
    return
  }
  func.func @transform_0(%arg0: i32) -> (i32, i32) {
    %c0_i32 = arith.constant 0 : i32
    %c0_i32_0 = arith.constant 0 : i32
    return %c0_i32, %arg0 : i32, i32
  }
  func.func @transform_1(%arg0: i32) -> (i32, i32) {
    %c0_i32 = arith.constant 0 : i32
    %c0_i32_0 = arith.constant 0 : i32
    %c0_i32_1 = arith.constant 0 : i32
    return %c0_i32, %c0_i32_0 : i32, i32
  }
  func.func @transform_2(%arg0: i32) -> (i32, i32) {
    %c0_i32 = arith.constant 0 : i32
    %c0_i32_0 = arith.constant 0 : i32
    return %c0_i32, %arg0 : i32, i32
  }
}

</mosaic_0001>

<bundles_post_ra>
// kernel: tpu_custom_call.1
= control target key start
LH: loop header
LB: loop body
LE: loop exit
PB: predicated region body
PF: predicated region fallthrough
CT: control target
= control target key end

     0   :  { %v108_v1 = vmov 0   ;;  %s140_s0 = inlined_call_operand.vmem [shape: f32[11,128], index: 0, kind: input, shape index: {}]   ;;  %s141_s1 = inlined_call_operand.vmem [shape: f32[11,1], index: 1, kind: input, shape index: {}]   ;;  %s142_s2 = inlined_call_operand.hbm [shape: f32[1,128], index: 2, kind: output, shape index: {}]  }
   0x1   :  { %v15_v0 = vld [vmem:[%s141_s1 + $0x8] sm:$0x7]  ;;  %77 = vset.pattern.permute.xlu0 %v108_v1 }
   0x2   :  { %7 = vsyncpa [#allocation3], 0  ;;  %23 = vperm.xlu0 %77, %v15_v0   ;;  %v14_v2 = vld [vmem:[%s141_s1] sm:$0xff]  ;;  %v13_v4 = vld [vmem:[%s140_s0 + $0x8] sm:$0x7]  ;;  %vm28_vm0 = vcmask 1042432  }
   0x3   :  { %v12_v6 = vld [vmem:[%s140_s0] sm:$0xff]  ;;  %s109_s0 = smov [#allocation2]   ;;  %s65_s19 = sshll.u32 %s142_s2, 4  ;;  %s66_s19 = int_to_ptr.hbm [resolvable:$true] %s65_s19 }
   0x4   :  { %s63_s1 = sshll.u32 %s109_s0, 4  ;;  %s64_s1 = int_to_ptr.vmem [resolvable:$true] %s63_s1 }
   0xa   :  { %18 = vperm.xlu0 %77, %v14_v2  }
  0x74   :  { %v24_v3 = vpop.permute.xlu0 %23 }
  0x75   :  { %v27_v5 = vmul.f32 %v24_v3, %v13_v4 }
  0x77   :  { %v29_v9 = vsel %vm28_vm0, %v27_v5, 0.0 }
  0x7c   :  { %v19_v7 = vpop.permute.xlu0 %18 }
  0x7d   :  { %v26_v8 = vmul.f32 %v19_v7, %v12_v6 }
  0x7f   :  { %v30_v10 = vadd.f32 %v29_v9, %v26_v8 }
  0x81   :  { %v31_v11 = vrot.slane %v30_v10, 4 }
  0x83   :  { %v32_v12 = vadd.f32 %v31_v11, %v30_v10 }
  0x85   :  { %v33_v13 = vrot.slane %v32_v12, 2 }
  0x87   :  { %v34_v14 = vadd.f32 %v33_v13, %v32_v12 }
  0x89   :  { %v35_v15 = vrot.slane %v34_v14, 1 }
  0x8b   :  { %v36_v16 = vadd.f32 %v35_v15, %v34_v14 }
  0x8d   :  { %v74_v17 = vmul.f32 -1.442695, %v36_v16 }
  0x8f   :  { %78 = vpow2.f32 %v74_v17 }
  0x95   :  { %v79_v18 = vpop.eup %78 }
  0x96   :  { %v40_v19 = vadd.f32 1.0, %v79_v18 }
  0x98   :  { %80 = vrcp.f32 %v40_v19  ;;  %v52_v23 = vand.u32 2147483648, %v40_v19  ;;  %v50_v25 = vand.u32 2147483647, %v40_v19  ;;  %vm46_vm2 = vweird.f32 %v40_v19 }
  0x9a   :  { %v53_v27 = vor.u32 1.1754944e-38, %v52_v23  ;;  %vm51_vm4 = vcmp.eq.f32.partialorder %v50_v25, 8.507059e+37 }
  0x9e   :  { %v81_v20 = vpop.eup %80 }
  0x9f   :  { %v42_v21 = vmul.f32 %v81_v20, %v40_v19  ;;  %vm47_vm1 = vweird.f32 %v81_v20 }
  0xa0   :  { %vm48_vm3 = vmor %vm46_vm2, %vm47_vm1 }
  0xa1   :  { %v43_v22 = vsub.f32 1.0, %v42_v21 }
  0xa3   :  { %v44_v24 = vmul.f32 %v81_v20, %v43_v22 }
  0xa5   :  { %v45_v26 = vadd.f32 %v81_v20, %v44_v24 }
  0xa7   :  { %v49_v28 = vsel %vm48_vm3, %v81_v20, %v45_v26 }
  0xa8   :  { %v54_v29 = vsel %vm51_vm4, %v53_v27, %v49_v28 }
  0xa9   :  { %v56_v30 = vmul.f32 0.9, %v54_v29 }
  0xab   :  { %57 = vst [vmem:[#allocation2] sm:$0x1] %v56_v30 }
  0xac   :  { %68 = dma.vmem_to_hbm [thread:$0]  %s64_s1, 16, %s66_s19, [#allocation3]  }
  0xad   :  { %106 = dma.done.wait [#allocation3], 16  }
  0xae   :  { %107 = vsyncadd [#allocation3], 4294967280 }
  0xaf   :  { %73 = vsyncpa [#allocation3], 1 }

</bundles_post_ra>
